<compile_context>
chip_gen: v6e
topology: v6e:2x2x1
jax: 0.10.0
libtpu: 0.0.40
codegen_flags: <defaults>
</compile_context>

<pallas_src>
import math

import jax
import jax.numpy as jnp
from jax.experimental import pallas as pl
from jax.experimental.pallas import tpu as pltpu


def patch_embed_kernel(patches_ref, clin_ref, w_p_ref, w_e_ref,
                       pos_e_ref, pos_p_ref, out_ref):
    """One grid step == `tb` batch elements (tb*Np rows through the MXU).

    patches_ref : (tb*Np, patch_dim)   bf16   (2-D, layout-native matmul LHS)
    clin_ref    : (tb, 1, n_clin)      f32    (tiled per grid step)
    w_p_ref     : (patch_dim, hidden)  bf16   conv weight as a matmul
    w_e_ref     : (n_clin, hidden)     f32
    pos_e_ref   : (1, hidden)          f32    pos[0]  + b_ehr  (bias folded)
    pos_p_ref   : (Np, hidden)         f32    pos[1:] + b_conv (bias folded)
    out_ref     : (tb, Np+1, hidden)
    """
    tb, seq, hid = out_ref.shape
    np_ = seq - 1

    # ---- patch embeddings: one (tb*Np, patch_dim) @ (patch_dim, hid) MXU pass.
    x = patches_ref[...]                                                # bf16
    pe = jnp.dot(x, w_p_ref[...], preferred_element_type=jnp.float32)  # f32 acc
    pe = pe.reshape(tb, np_, hid) + pos_p_ref[...][None]                # bias in pos
    # slice store (no concatenate): sequence rows 1..Np of this batch tile
    out_ref[:, pl.ds(1, np_), :] = pe.astype(out_ref.dtype)

    # ---- EHR token (sequence position 0): tiny (tb, n_clin)@(n_clin, hid)
    # matmul per batch tile, f32 for accuracy.
    clin = clin_ref[:, 0, :]                                            # (tb, n_clin)
    ce = jnp.dot(clin, w_e_ref[...], preferred_element_type=jnp.float32)
    ce = ce + pos_e_ref[...]                                            # bias in pos
    out_ref[:, pl.ds(0, 1), :] = ce[:, None, :].astype(out_ref.dtype)
    # TODO(synk): dropout_rate=0.0 -> nn.Dropout is identity; a nonzero rate
    # would need pltpu.prng_seed/prng_random_bits masking inside the kernel.


def patch_embedding_forward(img, clin_var, w_conv, b_conv, w_ehr, b_ehr,
                            pos_emb, patch_size, *,
                            out_dtype=jnp.float32,
                            target_tile_bytes=2 << 20):
    """Pallas-backed forward of PatchEmbeddingBlock (conv patch embedding).

    Note: `w_ehr` must be (in, out) = (n_clin, hidden); a PyTorch
    nn.Linear.weight is (out, in) and must be transposed when porting.
    """
    B, C, D, H, W = img.shape
    p = patch_size
    hid = w_conv.shape[0]
    nd, nh, nw = D // p, H // p, W // p
    Np = nd * nh * nw
    patch_dim = C * p * p * p
    n_clin = clin_var.shape[1]
    assert w_conv.shape == (hid, C, p, p, p), w_conv.shape
    assert w_ehr.shape == (n_clin, hid), (
        "w_ehr must be (in, out); transpose PyTorch nn.Linear.weight", w_ehr.shape)
    assert pos_emb.reshape(-1, hid).shape[0] == Np + 1, pos_emb.shape

    # --- glue (plain JAX): bf16 patchification + parameter prep --------------
    # Cast to bf16 BEFORE the 8-D transpose so the patch slab XLA materializes
    # is half-width (the transpose itself cannot be lowered inside the kernel).
    patches = img.astype(jnp.bfloat16).reshape(B, C, nd, p, nh, p, nw, p)
    patches = patches.transpose(0, 2, 4, 6, 1, 3, 5, 7).reshape(B * Np, patch_dim)

    w_p = w_conv.reshape(hid, patch_dim).T.astype(jnp.bfloat16)   # (patch_dim, hid)
    w_e = w_ehr.astype(jnp.float32)                               # (n_clin, hid)
    pos = pos_emb.reshape(Np + 1, hid).astype(jnp.float32)
    # Fold biases into the position embeddings (drops two kernel operands):
    pos_e = pos[0:1, :] + b_ehr.reshape(1, hid).astype(jnp.float32)   # EHR row
    pos_p = pos[1:, :] + b_conv.reshape(1, hid).astype(jnp.float32)   # patch rows
    clin = clin_var.astype(jnp.float32).reshape(B, 1, n_clin)

    # --- batch tile: size by bytes, keep tb*Np % 8 == 0, prefer >= 2 steps ----
    bytes_per_b = Np * patch_dim * 2                      # bf16 patches per batch elem
    tb = max(1, min(B, target_tile_bytes // max(bytes_per_b, 1)))
    if B >= 2:
        tb = min(tb, max(1, B // 2))                      # >= 2 grid steps (v7x 2 TCs)
    g = 8 // math.gcd(Np, 8)                              # tb granularity: tb*Np % 8 == 0
    tb = max(g, (tb // g) * g)
    n_steps = -(-B // tb)
    B_pad = n_steps * tb
    if B_pad != B:                                        # non-divisible B: pad, slice back
        patches = jnp.pad(patches, ((0, (B_pad - B) * Np), (0, 0)))
        clin = jnp.pad(clin, ((0, B_pad - B), (0, 0), (0, 0)))
    grid = (n_steps,)

    # --- VMEM budget (double-buffered blocks, lane/sublane padded) + cost -----
    f32b, bf16b = 4, 2
    lane_hid = max(hid, 128)
    vmem_needed = (
        2 * tb * Np * patch_dim * bf16b                   # patches tile
        + 2 * tb * 1 * 128 * f32b                         # clin tile
        + 2 * patch_dim * lane_hid * bf16b                # w_p
        + 2 * (n_clin + Np + 8 + 8) * lane_hid * f32b     # w_e / pos_e / pos_p
        + 2 * tb * (Np + 1) * lane_hid * f32b)            # output tile
    vmem_limit = max(16 << 20, min(2 * vmem_needed + (2 << 20), 40 << 20))

    out_bytes = jnp.dtype(out_dtype).itemsize
    flops = 2 * B * Np * patch_dim * hid + 2 * B * n_clin * hid
    bytes_accessed = (
        patches.size * bf16b + clin.size * f32b + w_p.size * bf16b
        + (w_e.size + pos_e.size + pos_p.size) * f32b
        + B_pad * (Np + 1) * hid * out_bytes)

    out = pl.pallas_call(
        patch_embed_kernel,
        out_shape=jax.ShapeDtypeStruct((B_pad, Np + 1, hid), out_dtype),
        grid=grid,
        in_specs=[
            pl.BlockSpec((tb * Np, patch_dim), lambda i: (i, 0)),
            pl.BlockSpec((tb, 1, n_clin),      lambda i: (i, 0, 0)),
            pl.BlockSpec((patch_dim, hid),     lambda i: (0, 0)),
            pl.BlockSpec((n_clin, hid),        lambda i: (0, 0)),
            pl.BlockSpec((1, hid),             lambda i: (0, 0)),
            pl.BlockSpec((Np, hid),            lambda i: (0, 0)),
        ],
        out_specs=pl.BlockSpec((tb, Np + 1, hid), lambda i: (i, 0, 0)),
        compiler_params=pltpu.CompilerParams(
            dimension_semantics=("parallel",),
            vmem_limit_bytes=int(vmem_limit)),
        cost_estimate=pl.CostEstimate(
            flops=int(flops), transcendentals=0,
            bytes_accessed=int(bytes_accessed)),
    )(patches, clin, w_p, w_e, pos_e, pos_p)
    return out[:B] if B_pad != B else out


def reference_forward(img, clin_var, w_conv, b_conv, w_ehr, b_ehr, pos_emb, p,
                      *, matmul_dtype=jnp.float32):
    """Pure-JAX reference mirroring the PyTorch forward semantics.

    `matmul_dtype=jnp.bfloat16` reproduces the kernel's bf16-input / f32-accum
    MXU numerics for a tight comparison.
    """
    conv = jax.lax.conv_general_dilated(
        img.astype(matmul_dtype), w_conv.astype(matmul_dtype),
        window_strides=(p, p, p), padding="VALID",
        dimension_numbers=("NCDHW", "OIDHW", "NCDHW"),
        preferred_element_type=jnp.float32)
    conv = conv + b_conv.reshape(1, -1, 1, 1, 1)
    B, hid = conv.shape[0], conv.shape[1]
    x = conv.reshape(B, hid, -1).transpose(0, 2, 1)          # flatten(2).transpose
    ce = clin_var @ w_ehr + b_ehr                            # (B, hid)
    x = jnp.concatenate([ce[:, None, :], x], axis=1)
    return x + pos_emb.reshape(1, -1, hid)                   # dropout(p=0) = identity


def trunc_normal(key, shape, std=0.02):
    return jax.random.truncated_normal(key, -2.0, 2.0, shape, jnp.float32) * std


if __name__ == "__main__":
    # Small shapes consistent with the module: in_channels=4, img_size=16,
    # patch_size=8, hidden_size=32, num_heads=4, spatial_dims=3, n_clin_var=27.
    B, C, S = 2, 4, 16
    PATCH, HID, N_CLIN = 8, 32, 27
    Np = (S // PATCH) ** 3            # 8 spatial patches; sequence length = Np + 1

    key = jax.random.PRNGKey(0)
    k_img, k_clin, k_wc, k_we, k_pos = jax.random.split(key, 5)

    img = jax.random.normal(k_img, (B, C, S, S, S), jnp.float32)
    clin_var = jax.random.normal(k_clin, (B, N_CLIN), jnp.float32)

    # Deterministic synthetic parameter init (shapes from __init__):
    w_conv = trunc_normal(k_wc, (HID, C, PATCH, PATCH, PATCH))   # Conv3d weight
    b_conv = jnp.zeros((HID,), jnp.float32)                      # Conv3d bias
    w_ehr = trunc_normal(k_we, (N_CLIN, HID))                    # Linear (in, out)
    b_ehr = jnp.zeros((HID,), jnp.float32)                       # zero per _init_weights
    pos_emb = trunc_normal(k_pos, (1, Np + 1, HID))              # position_embeddings
    # cls_token exists in __init__ but is unused in forward().

    out = patch_embedding_forward(img, clin_var, w_conv, b_conv, w_ehr, b_ehr,
                                  pos_emb, PATCH)
    out = jax.block_until_ready(out)
    assert out.shape == (B, Np + 1, HID), out.shape

    # Tight check against a reference with the same bf16-input/f32-accum numerics.
    ref_bf16 = reference_forward(img, clin_var, w_conv, b_conv, w_ehr, b_ehr,
                                 pos_emb, PATCH, matmul_dtype=jnp.bfloat16)
    assert jnp.allclose(out, ref_bf16, atol=5e-3, rtol=5e-3), \
        float(jnp.max(jnp.abs(out - ref_bf16)))

    # Looser check against the exact f32 forward semantics.
    ref_f32 = reference_forward(img, clin_var, w_conv, b_conv, w_ehr, b_ehr,
                                pos_emb, PATCH, matmul_dtype=jnp.float32)
    assert jnp.allclose(out, ref_f32, atol=5e-2, rtol=5e-2), \
        float(jnp.max(jnp.abs(out - ref_f32)))

    print("KERNEL_OK")
</pallas_src>

<mosaic_0001>
module attributes {stable_mosaic.version = 11 : i64} {
  func.func @patch_embed_kernel(%arg0: i32, %arg1: memref<8x2048xbf16, #tpu.memory_space<vmem>>, %arg2: memref<1x1x27xf32, #tpu.memory_space<vmem>>, %arg3: memref<2048x32xbf16, #tpu.memory_space<vmem>>, %arg4: memref<27x32xf32, #tpu.memory_space<vmem>>, %arg5: memref<1x32xf32, #tpu.memory_space<vmem>>, %arg6: memref<8x32xf32, #tpu.memory_space<vmem>>, %arg7: memref<1x9x32xf32, #tpu.memory_space<vmem>>) attributes {dimension_semantics = [#tpu.dimension_semantics<parallel>], iteration_bounds = array<i64: 2>, scalar_prefetch = 0 : i64, scratch_operands = 0 : i64, tpu.core_type = #tpu.core_type<tc>, window_params = [{transform_indices = @transform_0, window_bounds = array<i64: 8, 2048>}, {transform_indices = @transform_1, window_bounds = array<i64: 1, 1, 27>}, {pipeline_mode = #tpu.pipeline_mode<synchronous>, transform_indices = @transform_2, window_bounds = array<i64: 2048, 32>}, {pipeline_mode = #tpu.pipeline_mode<synchronous>, transform_indices = @transform_3, window_bounds = array<i64: 27, 32>}, {pipeline_mode = #tpu.pipeline_mode<synchronous>, transform_indices = @transform_4, window_bounds = array<i64: 1, 32>}, {pipeline_mode = #tpu.pipeline_mode<synchronous>, transform_indices = @transform_5, window_bounds = array<i64: 8, 32>}, {transform_indices = @transform_6, window_bounds = array<i64: 1, 9, 32>}]} {
    %c0 = arith.constant 0 : index
    %c0_0 = arith.constant 0 : index
    %0 = vector.load %arg1[%c0, %c0_0] : memref<8x2048xbf16, #tpu.memory_space<vmem>>, vector<8x2048xbf16>
    %c0_1 = arith.constant 0 : index
    %c0_2 = arith.constant 0 : index
    %1 = vector.load %arg3[%c0_1, %c0_2] : memref<2048x32xbf16, #tpu.memory_space<vmem>>, vector<2048x32xbf16>
    %cst = arith.constant dense<0.000000e+00> : vector<8x32xf32>
    %2 = tpu.matmul %0, %1, %cst {dimension_numbers = #tpu.dot_dimension_numbers<[1], [0], [0], [1], [0, 0, 1, 1], [], []>} : vector<8x2048xbf16>, vector<2048x32xbf16>, vector<8x32xf32> -> vector<8x32xf32>
    %3 = vector.shape_cast %2 : vector<8x32xf32> to vector<1x8x32xf32>
    %c0_3 = arith.constant 0 : index
    %c0_4 = arith.constant 0 : index
    %4 = vector.load %arg6[%c0_3, %c0_4] : memref<8x32xf32, #tpu.memory_space<vmem>>, vector<8x32xf32>
    %5 = vector.shape_cast %4 : vector<8x32xf32> to vector<1x8x32xf32>
    %6 = arith.addf %3, %5 : vector<1x8x32xf32>
    %c0_5 = arith.constant 0 : index
    %c1 = arith.constant 1 : index
    %c0_6 = arith.constant 0 : index
    %7 = vector.load %arg7[%c0_5, %c1, %c0_6] : memref<1x9x32xf32, #tpu.memory_space<vmem>>, vector<1x8x32xf32>
    tpu.vector_store %arg7[%c0_5, %c1, %c0_6], %6 {strides = array<i32>} : memref<1x9x32xf32, #tpu.memory_space<vmem>>, vector<1x8x32xf32>,
    %c0_7 = arith.constant 0 : index
    %c0_8 = arith.constant 0 : index
    %c0_9 = arith.constant 0 : index
    %8 = vector.load %arg2[%c0_7, %c0_8, %c0_9] : memref<1x1x27xf32, #tpu.memory_space<vmem>>, vector<1x1x27xf32>
    %9 = vector.shape_cast %8 : vector<1x1x27xf32> to vector<1x27xf32>
    %c0_10 = arith.constant 0 : index
    %c0_11 = arith.constant 0 : index
    %10 = vector.load %arg4[%c0_10, %c0_11] : memref<27x32xf32, #tpu.memory_space<vmem>>, vector<27x32xf32>
    %cst_12 = arith.constant dense<0.000000e+00> : vector<1x32xf32>
    %11 = tpu.matmul %9, %10, %cst_12 {dimension_numbers = #tpu.dot_dimension_numbers<[1], [0], [0], [1], [0, 0, 1, 1], [], []>} : vector<1x27xf32>, vector<27x32xf32>, vector<1x32xf32> -> vector<1x32xf32>
    %c0_13 = arith.constant 0 : index
    %c0_14 = arith.constant 0 : index
    %12 = vector.load %arg5[%c0_13, %c0_14] : memref<1x32xf32, #tpu.memory_space<vmem>>, vector<1x32xf32>
    %13 = arith.addf %11, %12 : vector<1x32xf32>
    %14 = vector.shape_cast %13 : vector<1x32xf32> to vector<1x1x32xf32>
    %c0_15 = arith.constant 0 : index
    %c0_16 = arith.constant 0 : index
    %c0_17 = arith.constant 0 : index
    %15 = vector.load %arg7[%c0_15, %c0_16, %c0_17] : memref<1x9x32xf32, #tpu.memory_space<vmem>>, vector<1x1x32xf32>
    tpu.vector_store %arg7[%c0_15, %c0_16, %c0_17], %14 {strides = array<i32>} : memref<1x9x32xf32, #tpu.memory_space<vmem>>, vector<1x1x32xf32>,
    return
  }
  func.func @transform_0(%arg0: i32) -> (i32, i32) {
    %c0_i32 = arith.constant 0 : i32
    %c0_i32_0 = arith.constant 0 : i32
    return %arg0, %c0_i32 : i32, i32
  }
  func.func @transform_1(%arg0: i32) -> (i32, i32, i32) {
    %c0_i32 = arith.constant 0 : i32
    %c0_i32_0 = arith.constant 0 : i32
    %c0_i32_1 = arith.constant 0 : i32
    return %arg0, %c0_i32, %c0_i32_0 : i32, i32, i32
  }
  func.func @transform_2(%arg0: i32) -> (i32, i32) {
    %c0_i32 = arith.constant 0 : i32
    %c0_i32_0 = arith.constant 0 : i32
    %c0_i32_1 = arith.constant 0 : i32
    return %c0_i32, %c0_i32_0 : i32, i32
  }
  func.func @transform_3(%arg0: i32) -> (i32, i32) {
    %c0_i32 = arith.constant 0 : i32
    %c0_i32_0 = arith.constant 0 : i32
    %c0_i32_1 = arith.constant 0 : i32
    return %c0_i32, %c0_i32_0 : i32, i32
  }
  func.func @transform_4(%arg0: i32) -> (i32, i32) {
    %c0_i32 = arith.constant 0 : i32
    %c0_i32_0 = arith.constant 0 : i32
    %c0_i32_1 = arith.constant 0 : i32
    return %c0_i32, %c0_i32_0 : i32, i32
  }
  func.func @transform_5(%arg0: i32) -> (i32, i32) {
    %c0_i32 = arith.constant 0 : i32
    %c0_i32_0 = arith.constant 0 : i32
    %c0_i32_1 = arith.constant 0 : i32
    return %c0_i32, %c0_i32_0 : i32, i32
  }
  func.func @transform_6(%arg0: i32) -> (i32, i32, i32) {
    %c0_i32 = arith.constant 0 : i32
    %c0_i32_0 = arith.constant 0 : i32
    %c0_i32_1 = arith.constant 0 : i32
    return %arg0, %c0_i32, %c0_i32_0 : i32, i32, i32
  }
}

</mosaic_0001>

<bundles_post_ra>
// kernel: tpu_custom_call.1
= control target key start
LH: loop header
LB: loop body
LE: loop exit
PB: predicated region body
PF: predicated region fallthrough
CT: control target
= control target key end

     0   :  { %s2379_s21 = smov 0   ;;  %s2820_s0 = inlined_call_operand.vmem [shape: bf16[16,2048], index: 0, kind: input, shape index: {}]   ;;  %s2821_s1 = inlined_call_operand.vmem [shape: f32[2,1,27], index: 1, kind: input, shape index: {}]   ;;  %s2822_s2 = inlined_call_operand.vmem [shape: bf16[2048,32], index: 2, kind: input, shape index: {}]   ;;  %s2823_s3 = inlined_call_operand.vmem [shape: f32[27,32], index: 3, kind: input, shape index: {}]   ;;  %s2824_s4 = inlined_call_operand.vmem [shape: f32[1,32], index: 4, kind: input, shape index: {}]   ;;  %s2825_s5 = inlined_call_operand.vmem [shape: f32[8,32], index: 5, kind: input, shape index: {}]   ;;  %s2826_s6 = inlined_call_operand.vmem [shape: f32[2,9,32], index: 6, kind: output, shape index: {}]  }
   0x1 LB: > { %s1829_s22 = sadd.s32 4294967295, %s2340_s21   ;;  %p1833_p0 = scmp.ge.s32.totalorder %s2340_s21, 1  ;;  %s2340_s21 = sphi %s2379_s21, %s16_s21  }
   0x2   : > { %p220_p1 = scmp.lt.s32.totalorder %s2340_s21, 3 }
   0x4   : > { %p221_p2 = pnand %p1833_p0, %p220_p1 }
   0x5   : > { %p253_p3 = scmp.lt.s32.totalorder (!%p221_p2), %s1829_s22, 1 }
   0x6   : > { %224 = sbr.rel (%p221_p2) target bundleno = 346 (0x15a), region = 44 }
   0xb   : > { %v2190_v0 = vld [vmem:[%s2822_s2 + $0x78] sm:$0xff]   ;;  %v2194_v4 = vld [vmem:[%s2822_s2 + $0x70] sm:$0xff]   ;;  %v2198_v8 = vld [vmem:[%s2822_s2 + $0x68] sm:$0xff]   ;;  %s2828_s22 = smov (!%p253_p3, %s1829_s22), 1  ;;  %vm1689_vm0 = vcmask 1042432   ;;  %vm2343_vm1 = vmmov 0  }
   0xc   : > { %v2191_v1 = vld [vmem:[%s2822_s2 + $0xf8] sm:$0xff]   ;;  %1988 = vmatprep.subr.bf16.mxu0 %v2190_v0  ;;  %v2195_v5 = vld [vmem:[%s2822_s2 + $0xf0] sm:$0xff]   ;;  %v2199_v9 = vld [vmem:[%s2822_s2 + $0xe8] sm:$0xff]   ;;  %s1986_s9 = sshll.u32 %s2828_s22, 6  ;;  %s260_s11 = scalar_lea.vmem %s2821_s1, %s2828_s22  ;;  %vm1685_vm2 = vcmask 220160   ;;  %vm1677_vm3 = vcmask 261120  }
   0xd   : > { %v2192_v2 = vld [vmem:[%s2822_s2 + $0x38] sm:$0xff]   ;;  %2010 = vmatprep.subr.bf16.mxu1 %v2191_v1  ;;  %v2196_v6 = vld [vmem:[%s2822_s2 + $0x30] sm:$0xff]   ;;  %v2200_v10 = vld [vmem:[%s2822_s2 + $0x28] sm:$0xff]   ;;  %s2487_s18 = scalar_lea.vmem %s2820_s0, %s1986_s9  ;;  %s1987_s14 = sshll.u32 %s2828_s22, 4  ;;  %vm1763_vm4 = vcmask 253952  }
   0xe   : > { %v2193_v3 = vld [vmem:[%s2822_s2 + $0xb8] sm:$0xff]   ;;  %1989 = vmatpush3.bf16.msra.mxu0 %v2192_v2  ;;  %v2197_v7 = vld [vmem:[%s2822_s2 + $0xb0] sm:$0xff]   ;;  %v2201_v11 = vld [vmem:[%s2822_s2 + $0xa8] sm:$0xff]   ;;  %s265_s24 = scalar_lea.vmem %s2826_s6, %s1987_s14 }
   0xf   : > { %2011 = vmatpush3.bf16.msra.mxu1 %v2193_v3  ;;  %1990 = vmatprep.subr.bf16.mxu0 %v2194_v4  ;;  %v2202_v12 = vld [vmem:[%s2822_s2 + $0x60] sm:$0xff]   ;;  %v2206_v16 = vld [vmem:[%s2822_s2 + $0x58] sm:$0xff]   ;;  %v2210_v20 = vld [vmem:[%s2822_s2 + $0x50] sm:$0xff]  }
  0x10   : > { %2012 = vmatprep.subr.bf16.mxu1 %v2195_v5  ;;  %v2203_v13 = vld [vmem:[%s2822_s2 + $0xe0] sm:$0xff]   ;;  %v2207_v17 = vld [vmem:[%s2822_s2 + $0xd8] sm:$0xff]   ;;  %v2211_v21 = vld [vmem:[%s2822_s2 + $0xd0] sm:$0xff]  }
  0x11   : > { %v2204_v14 = vld [vmem:[%s2822_s2 + $0x20] sm:$0xff]   ;;  %v2208_v18 = vld [vmem:[%s2822_s2 + $0x18] sm:$0xff]   ;;  %v2212_v22 = vld [vmem:[%s2822_s2 + $0x10] sm:$0xff]  }
  0x12   : > { %1991 = vmatpush3.bf16.msra.mxu0 %v2196_v6  ;;  %v2205_v15 = vld [vmem:[%s2822_s2 + $0xa0] sm:$0xff]   ;;  %v2209_v19 = vld [vmem:[%s2822_s2 + $0x98] sm:$0xff]   ;;  %v2213_v23 = vld [vmem:[%s2822_s2 + $0x90] sm:$0xff]  }
  0x13   : > { %2013 = vmatpush3.bf16.msra.mxu1 %v2197_v7  ;;  %1992 = vmatprep.subr.bf16.mxu0 %v2198_v8  ;;  %v2214_v24 = vld [vmem:[%s2822_s2 + $0x48] sm:$0xff]   ;;  %v2218_v28 = vld [vmem:[%s2822_s2 + $0x40] sm:$0xff]   ;;  %v2226_v38 = vld [vmem:[%s2822_s2 + $0x178] sm:$0xff]  }
  0x14   : > { %2014 = vmatprep.subr.bf16.mxu1 %v2199_v9  ;;  %v2215_v25 = vld [vmem:[%s2822_s2 + $0xc8] sm:$0xff]   ;;  %v2219_v29 = vld [vmem:[%s2822_s2 + $0xc0] sm:$0xff]   ;;  %v2227_v39 = vld [vmem:[%s2822_s2 + $0x1f8] sm:$0xff]  }
  0x15   : > { %v2216_v26 = vld [vmem:[%s2822_s2 + $0x8] sm:$0xff]   ;;  %v2220_v30 = vld [vmem:[%s2822_s2] sm:$0xff]   ;;  %v2228_v40 = vld [vmem:[%s2822_s2 + $0x138] sm:$0xff]  }
  0x16   : > { %1993 = vmatpush3.bf16.msra.mxu0 %v2200_v10  ;;  %v2217_v27 = vld [vmem:[%s2822_s2 + $0x88] sm:$0xff]   ;;  %v2221_v31 = vld [vmem:[%s2822_s2 + $0x80] sm:$0xff]   ;;  %v2229_v41 = vld [vmem:[%s2822_s2 + $0x1b8] sm:$0xff]  }
  0x17   : > { %2015 = vmatpush3.bf16.msra.mxu1 %v2201_v11  ;;  %1994 = vmatprep.subr.bf16.mxu0 %v2202_v12  ;;  %v267_v32 = vld [vmem:[%s2487_s18] sm:$0xff]  ;;  %v268_v33 = vld [vmem:[%s2487_s18 + $0x8] sm:$0xff]  ;;  %v2230_v42 = vld [vmem:[%s2822_s2 + $0x170] sm:$0xff]  }
  0x18   : > { %2016 = vmatprep.subr.bf16.mxu1 %v2203_v13  ;;  %v1838_v34 = vcombine.low %v267_v32, %v267_v32  ;;  %v1839_v35 = vcombine.high %v267_v32, %v267_v32  ;;  %v1840_v36 = vcombine.low %v268_v33, %v268_v33  ;;  %v1841_v37 = vcombine.high %v268_v33, %v268_v33  ;;  %v2231_v43 = vld [vmem:[%s2822_s2 + $0x1f0] sm:$0xff]   ;;  %v2234_v46 = vld [vmem:[%s2822_s2 + $0x168] sm:$0xff]   ;;  %v2238_v50 = vld [vmem:[%s2822_s2 + $0x160] sm:$0xff]  }
  0x19   : > { %v2232_v44 = vld [vmem:[%s2822_s2 + $0x130] sm:$0xff]   ;;  %v2235_v47 = vld [vmem:[%s2822_s2 + $0x1e8] sm:$0xff]   ;;  %v2239_v51 = vld [vmem:[%s2822_s2 + $0x1e0] sm:$0xff]  }
  0x1a   : > { %1995 = vmatpush3.bf16.msra.mxu0 %v2204_v14  ;;  %1387 = vmatprep.mubr.bf16.mxu0 %v1839_v35  ;;  %v2233_v45 = vld [vmem:[%s2822_s2 + $0x1b0] sm:$0xff]   ;;  %v2236_v48 = vld [vmem:[%s2822_s2 + $0x128] sm:$0xff]   ;;  %v2240_v52 = vld [vmem:[%s2822_s2 + $0x120] sm:$0xff]  }
  0x1b   : > { %2017 = vmatpush3.bf16.msra.mxu1 %v2205_v15  ;;  %1996 = vmatprep.subr.bf16.mxu0 %v2206_v16  ;;  %v2237_v49 = vld [vmem:[%s2822_s2 + $0x1a8] sm:$0xff]   ;;  %v2241_v53 = vld [vmem:[%s2822_s2 + $0x1a0] sm:$0xff]   ;;  %v2242_v54 = vld [vmem:[%s2822_s2 + $0x158] sm:$0xff]  }
  0x1c   : > { %2018 = vmatprep.subr.bf16.mxu1 %v2207_v17  ;;  %1427 = vmatprep.mubr.bf16.mxu1 %v1841_v37  ;;  %v2243_v55 = vld [vmem:[%s2822_s2 + $0x1d8] sm:$0xff]   ;;  %v2246_v58 = vld [vmem:[%s2822_s2 + $0x150] sm:$0xff]   ;;  %v2250_v62 = vld [vmem:[%s2822_s2 + $0x148] sm:$0xff]  }
  0x1d   : > { %v2244_v56 = vld [vmem:[%s2822_s2 + $0x118] sm:$0xff]   ;;  %v2247_v59 = vld [vmem:[%s2822_s2 + $0x1d0] sm:$0xff]   ;;  %v2251_v63 = vld [vmem:[%s2822_s2 + $0x1c8] sm:$0xff]  }
  0x1e   : > { %1997 = vmatpush3.bf16.msra.mxu0 %v2208_v18  ;;  %v2245_v57 = vld [vmem:[%s2822_s2 + $0x198] sm:$0xff]   ;;  %v2248_v60 = vld [vmem:[%s2822_s2 + $0x110] sm:$0xff]   ;;  %v2252_v0 = vld [vmem:[%s2822_s2 + $0x108] sm:$0xff]  }
  0x1f   : > { %2019 = vmatpush3.bf16.msra.mxu1 %v2209_v19  ;;  %1998 = vmatprep.subr.bf16.mxu0 %v2210_v20  ;;  %v2249_v61 = vld [vmem:[%s2822_s2 + $0x190] sm:$0xff]   ;;  %v2253_v1 = vld [vmem:[%s2822_s2 + $0x188] sm:$0xff]   ;;  %v2254_v2 = vld [vmem:[%s2822_s2 + $0x140] sm:$0xff]  }
  0x20   : > { %2020 = vmatprep.subr.bf16.mxu1 %v2211_v21  ;;  %v2255_v3 = vld [vmem:[%s2822_s2 + $0x1c0] sm:$0xff]   ;;  %v269_v6 = vld [vmem:[%s2487_s18 + $0x10] sm:$0xff]  ;;  %v270_v9 = vld [vmem:[%s2487_s18 + $0x18] sm:$0xff] }
  0x21   : > { %v2256_v4 = vld [vmem:[%s2822_s2 + $0x100] sm:$0xff]   ;;  %v1842_v7 = vcombine.low %v269_v6, %v269_v6  ;;  %v1843_v8 = vcombine.high %v269_v6, %v269_v6  ;;  %v1844_v10 = vcombine.low %v270_v9, %v270_v9  ;;  %v1845_v11 = vcombine.high %v270_v9, %v270_v9  ;;  %v2262_v12 = vld [vmem:[%s2822_s2 + $0x278] sm:$0xff]   ;;  %v2266_v16 = vld [vmem:[%s2822_s2 + $0x270] sm:$0xff]  }
  0x22   : > { %1999 = vmatpush3.bf16.msra.mxu0 %v2212_v22  ;;  %v2257_v5 = vld [vmem:[%s2822_s2 + $0x180] sm:$0xff]   ;;  %v2263_v13 = vld [vmem:[%s2822_s2 + $0x2f8] sm:$0xff]   ;;  %v2267_v17 = vld [vmem:[%s2822_s2 + $0x2f0] sm:$0xff]  }
  0x23   : > { %2021 = vmatpush3.bf16.msra.mxu1 %v2213_v23  ;;  %2000 = vmatprep.subr.bf16.mxu0 %v2214_v24  ;;  %v2264_v14 = vld [vmem:[%s2822_s2 + $0x238] sm:$0xff]   ;;  %v2268_v18 = vld [vmem:[%s2822_s2 + $0x230] sm:$0xff]   ;;  %v2270_v20 = vld [vmem:[%s2822_s2 + $0x268] sm:$0xff]  }
  0x24   : > { %2022 = vmatprep.subr.bf16.mxu1 %v2215_v25  ;;  %v2265_v15 = vld [vmem:[%s2822_s2 + $0x2b8] sm:$0xff]   ;;  %v2269_v19 = vld [vmem:[%s2822_s2 + $0x2b0] sm:$0xff]   ;;  %v2271_v21 = vld [vmem:[%s2822_s2 + $0x2e8] sm:$0xff]  }
  0x25   : > { %v2272_v22 = vld [vmem:[%s2822_s2 + $0x228] sm:$0xff]   ;;  %v2274_v24 = vld [vmem:[%s2822_s2 + $0x260] sm:$0xff]   ;;  %v2282_v32 = vld [vmem:[%s2822_s2 + $0x250] sm:$0xff]  }
  0x26   : > { %2001 = vmatpush3.bf16.msra.mxu0 %v2216_v26  ;;  %v2273_v23 = vld [vmem:[%s2822_s2 + $0x2a8] sm:$0xff]   ;;  %v2275_v25 = vld [vmem:[%s2822_s2 + $0x2e0] sm:$0xff]   ;;  %v2283_v33 = vld [vmem:[%s2822_s2 + $0x2d0] sm:$0xff]  }
  0x27   : > { %2023 = vmatpush3.bf16.msra.mxu1 %v2217_v27  ;;  %2002 = vmatprep.subr.bf16.mxu0 %v2218_v28  ;;  %v2276_v26 = vld [vmem:[%s2822_s2 + $0x220] sm:$0xff]   ;;  %v2278_v28 = vld [vmem:[%s2822_s2 + $0x258] sm:$0xff]   ;;  %v2285_v35 = vld [vmem:[%s2822_s2 + $0x290] sm:$0xff]  }
  0x28   : > { %2024 = vmatprep.subr.bf16.mxu1 %v2219_v29  ;;  %v2277_v27 = vld [vmem:[%s2822_s2 + $0x2a0] sm:$0xff]   ;;  %v2279_v29 = vld [vmem:[%s2822_s2 + $0x2d8] sm:$0xff]   ;;  %v2287_v37 = vld [vmem:[%s2822_s2 + $0x2c8] sm:$0xff]  }
  0x29   : > { %v2318_v6 = vld [vmem:[%s2822_s2 + $0x350] sm:$0xff]  }
  0x2a   : > { %2003 = vmatpush3.bf16.msra.mxu0 %v2220_v30  ;;  %v2280_v30 = vld [vmem:[%s2822_s2 + $0x218] sm:$0xff]   ;;  %v2321_v9 = vld [vmem:[%s2822_s2 + $0x390] sm:$0xff]  }
  0x2b   : > { %2025 = vmatpush3.bf16.msra.mxu1 %v2221_v31  ;;  %2032 = vmatprep.subr.bf16.mxu0 %v2226_v38  ;;  %v2281_v31 = vld [vmem:[%s2822_s2 + $0x298] sm:$0xff]   ;;  %v2288_v38 = vld [vmem:[%s2822_s2 + $0x208] sm:$0xff]  }
  0x2c   : > { %2054 = vmatprep.subr.bf16.mxu1 %v2227_v39  ;;  %v2289_v39 = vld [vmem:[%s2822_s2 + $0x288] sm:$0xff]  }
  0x2d   : > { %1388 = vmatmul.mubr.bf16.vlgmr.msra.gmra.mxu0 %v1838_v34  ;;  %v2284_v34 = vld [vmem:[%s2822_s2 + $0x210] sm:$0xff]  }
  0x2e   : > { %1428 = vmatmul.mubr.bf16.vlgmr.msra.gmra.mxu1 %v1840_v36  ;;  %2033 = vmatpush3.bf16.msra.mxu0 %v2228_v40  ;;  %v2286_v36 = vld [vmem:[%s2822_s2 + $0x248] sm:$0xff]   ;;  %v2290_v40 = vld [vmem:[%s2822_s2 + $0x240] sm:$0xff]  }
  0x2f   : > { %2055 = vmatpush3.bf16.msra.mxu1 %v2229_v41  ;;  %2034 = vmatprep.subr.bf16.mxu0 %v2230_v42  ;;  %v2291_v41 = vld [vmem:[%s2822_s2 + $0x2c0] sm:$0xff]  }
  0x30   : > { %2056 = vmatprep.subr.bf16.mxu1 %v2231_v43  ;;  %1467 = vmatprep.mubr.bf16.mxu0 %v1843_v8  ;;  %v2292_v42 = vld [vmem:[%s2822_s2 + $0x200] sm:$0xff]   ;;  %v2320_v8 = vld [vmem:[%s2822_s2 + $0x310] sm:$0xff]  }
  0x31   : > { %1507 = vmatprep.mubr.bf16.mxu1 %v1845_v11  ;;  %v2293_v43 = vld [vmem:[%s2822_s2 + $0x280] sm:$0xff]   ;;  %v2323_v11 = vld [vmem:[%s2822_s2 + $0x3c8] sm:$0xff]  }
  0x32   : > { %2035 = vmatpush3.bf16.msra.mxu0 %v2232_v44  ;;  %v271_v44 = vld [vmem:[%s2487_s18 + $0x20] sm:$0xff] }
  0x33   : > { %2057 = vmatpush3.bf16.msra.mxu1 %v2233_v45  ;;  %2036 = vmatprep.subr.bf16.mxu0 %v2234_v46  ;;  %v272_v45 = vld [vmem:[%s2487_s18 + $0x28] sm:$0xff]  ;;  %v1846_v46 = vcombine.low %v271_v44, %v271_v44 }
  0x34   : > { %2058 = vmatprep.subr.bf16.mxu1 %v2235_v47  ;;  %v1847_v47 = vcombine.high %v271_v44, %v271_v44 }
  0x36   : > { %2037 = vmatpush3.bf16.msra.mxu0 %v2236_v48  ;;  %v1848_v48 = vcombine.low %v272_v45, %v272_v45 }
  0x37   : > { %2059 = vmatpush3.bf16.msra.mxu1 %v2237_v49  ;;  %2038 = vmatprep.subr.bf16.mxu0 %v2238_v50  ;;  %v1849_v49 = vcombine.high %v272_v45, %v272_v45  ;;  %v2298_v50 = vld [vmem:[%s2822_s2 + $0x378] sm:$0xff]  }
  0x38   : > { %2060 = vmatprep.subr.bf16.mxu1 %v2239_v51  ;;  %v2299_v51 = vld [vmem:[%s2822_s2 + $0x3f8] sm:$0xff]  }
  0x3a   : > { %2039 = vmatpush3.bf16.msra.mxu0 %v2240_v52  ;;  %v2300_v52 = vld [vmem:[%s2822_s2 + $0x338] sm:$0xff]  }
  0x3b   : > { %2061 = vmatpush3.bf16.msra.mxu1 %v2241_v53  ;;  %2040 = vmatprep.subr.bf16.mxu0 %v2242_v54  ;;  %v2301_v53 = vld [vmem:[%s2822_s2 + $0x3b8] sm:$0xff]   ;;  %v2302_v54 = vld [vmem:[%s2822_s2 + $0x370] sm:$0xff]  }
  0x3c   : > { %2062 = vmatprep.subr.bf16.mxu1 %v2243_v55  ;;  %v2303_v55 = vld [vmem:[%s2822_s2 + $0x3f0] sm:$0xff]  }
  0x3e   : > { %2041 = vmatpush3.bf16.msra.mxu0 %v2244_v56  ;;  %v2304_v56 = vld [vmem:[%s2822_s2 + $0x330] sm:$0xff]  }
  0x3f   : > { %2063 = vmatpush3.bf16.msra.mxu1 %v2245_v57  ;;  %2042 = vmatprep.subr.bf16.mxu0 %v2246_v58  ;;  %v2305_v57 = vld [vmem:[%s2822_s2 + $0x3b0] sm:$0xff]   ;;  %v2306_v58 = vld [vmem:[%s2822_s2 + $0x368] sm:$0xff]  }
  0x40   : > { %2064 = vmatprep.subr.bf16.mxu1 %v2247_v59  ;;  %v2307_v59 = vld [vmem:[%s2822_s2 + $0x3e8] sm:$0xff]  }
  0x42   : > { %2043 = vmatpush3.bf16.msra.mxu0 %v2248_v60  ;;  %v2308_v60 = vld [vmem:[%s2822_s2 + $0x328] sm:$0xff]  }
  0x43   : > { %2065 = vmatpush3.bf16.msra.mxu1 %v2249_v61  ;;  %2044 = vmatprep.subr.bf16.mxu0 %v2250_v62  ;;  %v2309_v61 = vld [vmem:[%s2822_s2 + $0x3a8] sm:$0xff]   ;;  %v2310_v62 = vld [vmem:[%s2822_s2 + $0x360] sm:$0xff]  }
  0x44   : > { %2066 = vmatprep.subr.bf16.mxu1 %v2251_v63  ;;  %v2311_v63 = vld [vmem:[%s2822_s2 + $0x3e0] sm:$0xff]  }
  0x46   : > { %2045 = vmatpush3.bf16.msra.mxu0 %v2252_v0  ;;  %v2312_v0 = vld [vmem:[%s2822_s2 + $0x320] sm:$0xff]  }
  0x47   : > { %2067 = vmatpush3.bf16.msra.mxu1 %v2253_v1  ;;  %2046 = vmatprep.subr.bf16.mxu0 %v2254_v2  ;;  %v2313_v1 = vld [vmem:[%s2822_s2 + $0x3a0] sm:$0xff]   ;;  %v2314_v2 = vld [vmem:[%s2822_s2 + $0x358] sm:$0xff]  }
  0x48   : > { %2068 = vmatprep.subr.bf16.mxu1 %v2255_v3  ;;  %v2315_v3 = vld [vmem:[%s2822_s2 + $0x3d8] sm:$0xff]  }
  0x4a   : > { %2047 = vmatpush3.bf16.msra.mxu0 %v2256_v4  ;;  %v2316_v4 = vld [vmem:[%s2822_s2 + $0x318] sm:$0xff]  }
  0x4b   : > { %2069 = vmatpush3.bf16.msra.mxu1 %v2257_v5  ;;  %2076 = vmatprep.subr.bf16.mxu0 %v2262_v12  ;;  %v2317_v5 = vld [vmem:[%s2822_s2 + $0x398] sm:$0xff]   ;;  %v2324_v12 = vld [vmem:[%s2822_s2 + $0x308] sm:$0xff]  }
  0x4c   : > { %2098 = vmatprep.subr.bf16.mxu1 %v2263_v13  ;;  %v2325_v13 = vld [vmem:[%s2822_s2 + $0x388] sm:$0xff]  }
  0x4d   : > { %1468 = vmatmul.mubr.bf16.vlgmr.msra.gmra.mxu0 %v1842_v7  ;;  %v2319_v7 = vld [vmem:[%s2822_s2 + $0x3d0] sm:$0xff]  }
  0x4e   : > { %1508 = vmatmul.mubr.bf16.vlgmr.msra.gmra.mxu1 %v1844_v10  ;;  %2077 = vmatpush3.bf16.msra.mxu0 %v2264_v14  ;;  %v2322_v10 = vld [vmem:[%s2822_s2 + $0x348] sm:$0xff]   ;;  %v2326_v14 = vld [vmem:[%s2822_s2 + $0x340] sm:$0xff]  }
  0x4f   : > { %2099 = vmatpush3.bf16.msra.mxu1 %v2265_v15  ;;  %2078 = vmatprep.subr.bf16.mxu0 %v2266_v16  ;;  %v2327_v15 = vld [vmem:[%s2822_s2 + $0x3c0] sm:$0xff]  }
  0x50   : > { %2100 = vmatprep.subr.bf16.mxu1 %v2267_v17  ;;  %1547 = vmatprep.mubr.bf16.mxu0 %v1847_v47  ;;  %v2328_v16 = vld [vmem:[%s2822_s2 + $0x300] sm:$0xff]  }
  0x51   : > { %1587 = vmatprep.mubr.bf16.mxu1 %v1849_v49  ;;  %v2329_v17 = vld [vmem:[%s2822_s2 + $0x380] sm:$0xff]  }
  0x52   : > { %2079 = vmatpush3.bf16.msra.mxu0 %v2268_v18  ;;  %v273_v18 = vld [vmem:[%s2487_s18 + $0x30] sm:$0xff] }
  0x53   : > { %2101 = vmatpush3.bf16.msra.mxu1 %v2269_v19  ;;  %2080 = vmatprep.subr.bf16.mxu0 %v2270_v20  ;;  %v274_v19 = vld [vmem:[%s2487_s18 + $0x38] sm:$0xff]  ;;  %v1850_v20 = vcombine.low %v273_v18, %v273_v18 }
  0x54   : > { %2102 = vmatprep.subr.bf16.mxu1 %v2271_v21  ;;  %v1851_v21 = vcombine.high %v273_v18, %v273_v18 }
  0x56   : > { %2081 = vmatpush3.bf16.msra.mxu0 %v2272_v22  ;;  %v1852_v22 = vcombine.low %v274_v19, %v274_v19 }
  0x57   : > { %2103 = vmatpush3.bf16.msra.mxu1 %v2273_v23  ;;  %2082 = vmatprep.subr.bf16.mxu0 %v2274_v24  ;;  %v1853_v23 = vcombine.high %v274_v19, %v274_v19  ;;  %v2342_v24 = vmov 0.0  }
  0x58   : > { %2104 = vmatprep.subr.bf16.mxu1 %v2275_v25  ;;  %v1683_v25 = vld [vmem:[%s2823_s3 + $0x18] sm:$0x7] }
  0x5a   : > { %2083 = vmatpush3.bf16.msra.mxu0 %v2276_v26  ;;  %v1682_v26 = vld [vmem:[%s2823_s3 + $0x10] sm:$0xff] }
  0x5b   : > { %2105 = vmatpush3.bf16.msra.mxu1 %v2277_v27  ;;  %2084 = vmatprep.subr.bf16.mxu0 %v2278_v28  ;;  %v1681_v27 = vld [vmem:[%s2823_s3 + $0x8] sm:$0xff]  ;;  %v1680_v28 = vld [vmem:[%s2823_s3] sm:$0xff] }
  0x5c   : > { %2106 = vmatprep.subr.bf16.mxu1 %v2279_v29  ;;  %v1679_v29 = vld [vmem:[%s260_s11] sm:$0x1] }
  0x5e   : > { %2085 = vmatpush3.bf16.msra.mxu0 %v2280_v30 }
  0x5f   : > { %2107 = vmatpush3.bf16.msra.mxu1 %v2281_v31  ;;  %2086 = vmatprep.subr.bf16.mxu0 %v2282_v32 }
  0x60   : > { %2108 = vmatprep.subr.bf16.mxu1 %v2283_v33 }
  0x62   : > { %2087 = vmatpush3.bf16.msra.mxu0 %v2284_v34 }
  0x63   : > { %2109 = vmatpush3.bf16.msra.mxu1 %v2285_v35  ;;  %2088 = vmatprep.subr.bf16.mxu0 %v2286_v36 }
  0x64   : > { %2110 = vmatprep.subr.bf16.mxu1 %v2287_v37 }
  0x66   : > { %2089 = vmatpush3.bf16.msra.mxu0 %v2288_v38 }
  0x67   : > { %2111 = vmatpush3.bf16.msra.mxu1 %v2289_v39  ;;  %2090 = vmatprep.subr.bf16.mxu0 %v2290_v40 }
  0x68   : > { %2112 = vmatprep.subr.bf16.mxu1 %v2291_v41 }
  0x6a   : > { %2091 = vmatpush3.bf16.msra.mxu0 %v2292_v42 }
  0x6b   : > { %2113 = vmatpush3.bf16.msra.mxu1 %v2293_v43  ;;  %2120 = vmatprep.subr.bf16.mxu0 %v2298_v50 }
  0x6c   : > { %2142 = vmatprep.subr.bf16.mxu1 %v2299_v51 }
  0x6d   : > { %1548 = vmatmul.mubr.bf16.vlgmr.msra.gmra.mxu0 %v1846_v46 }
  0x6e   : > { %1588 = vmatmul.mubr.bf16.vlgmr.msra.gmra.mxu1 %v1848_v48  ;;  %2121 = vmatpush3.bf16.msra.mxu0 %v2300_v52 }
  0x6f   : > { %2143 = vmatpush3.bf16.msra.mxu1 %v2301_v53  ;;  %2122 = vmatprep.subr.bf16.mxu0 %v2302_v54 }
  0x70   : > { %2144 = vmatprep.subr.bf16.mxu1 %v2303_v55  ;;  %1627 = vmatprep.mubr.bf16.mxu0 %v1851_v21 }
  0x71   : > { %1667 = vmatprep.mubr.bf16.mxu1 %v1853_v23 }
  0x72   : > { %2123 = vmatpush3.bf16.msra.mxu0 %v2304_v56 }
  0x73   : > { %2145 = vmatpush3.bf16.msra.mxu1 %v2305_v57  ;;  %2124 = vmatprep.subr.bf16.mxu0 %v2306_v58 }
  0x74   : > { %2146 = vmatprep.subr.bf16.mxu1 %v2307_v59 }
  0x76   : > { %2125 = vmatpush3.bf16.msra.mxu0 %v2308_v60 }
  0x77   : > { %2147 = vmatpush3.bf16.msra.mxu1 %v2309_v61  ;;  %2126 = vmatprep.subr.bf16.mxu0 %v2310_v62 }
  0x78   : > { %2148 = vmatprep.subr.bf16.mxu1 %v2311_v63 }
  0x7a   : > { %2127 = vmatpush3.bf16.msra.mxu0 %v2312_v0 }
  0x7b   : > { %2149 = vmatpush3.bf16.msra.mxu1 %v2313_v1  ;;  %2128 = vmatprep.subr.bf16.mxu0 %v2314_v2 }
  0x7c   : > { %2150 = vmatprep.subr.bf16.mxu1 %v2315_v3 }
  0x7e   : > { %2129 = vmatpush3.bf16.msra.mxu0 %v2316_v4 }
  0x7f   : > { %2151 = vmatpush3.bf16.msra.mxu1 %v2317_v5  ;;  %2130 = vmatprep.subr.bf16.mxu0 %v2318_v6 }
  0x80   : > { %2152 = vmatprep.subr.bf16.mxu1 %v2319_v7 }
  0x82   : > { %2131 = vmatpush3.bf16.msra.mxu0 %v2320_v8 }
  0x83   : > { %2153 = vmatpush3.bf16.msra.mxu1 %v2321_v9  ;;  %2132 = vmatprep.subr.bf16.mxu0 %v2322_v10  ;;  %v1675_v10 = vld [vmem:[%s2825_s5] sm:$0xff] }
  0x84   : > { %2154 = vmatprep.subr.bf16.mxu1 %v2323_v11 }
  0x86   : > { %2133 = vmatpush3.bf16.msra.mxu0 %v2324_v12  ;;  %v1684_v12 = vld [vmem:[%s2824_s4] sm:$0x1] }
  0x87   : > { %2155 = vmatpush3.bf16.msra.mxu1 %v2325_v13  ;;  %2134 = vmatprep.subr.bf16.mxu0 %v2326_v14 }
  0x88   : > { %2156 = vmatprep.subr.bf16.mxu1 %v2327_v15 }
  0x8a   : > { %2135 = vmatpush3.bf16.msra.mxu0 %v2328_v16 }
  0x8b   : > { %2157 = vmatpush3.bf16.msra.mxu1 %v2329_v17  ;;  %2169 = vmatprep.subr.mxu0 %v2342_v24 }
  0x8d   : > { %1628 = vmatmul.mubr.bf16.vlgmr.msra.gmra.mxu0 %v1850_v20 }
  0x8e   : > { %1668 = vmatmul.mubr.bf16.vlgmr.msra.gmra.mxu1 %v1852_v22  ;;  %2170 = vmatpush3.msk.msra.mxu0 %vm1689_vm0, %v1683_v25 }
  0x8f   : > { %2171 = vmatprep.subr.mxu0 %v2342_v24  ;;  %2177 = vmatprep.mubr.msk.f32.mxu0 %vm2343_vm1, %v2342_v24 }
  0x90   : > { %2172 = vmatpush3.msra.mxu0 %v1682_v26 }
  0x91   : > { %2173 = vmatprep.subr.mxu0 %v2342_v24 }
  0x92   : > { %2174 = vmatpush3.msra.mxu0 %v1681_v27 }
  0x93   : > { %2175 = vmatprep.subr.mxu0 %v2342_v24 }
  0x94   : > { %2176 = vmatpush3.msra.mxu0 %v1680_v28 }
  0x95   : > { %2178 = vmatmul.mubr.msk.f32.vlgmr.msra.gmra.mxu0 %vm1685_vm2, %v1679_v29 }
  0xed   : > { %v2004_v30 = vpop.f32.mrf.mxu0 }
  0xee   : > { %v2026_v31 = vpop.f32.mrf.mxu1 }
  0xef   : > { %v2005_v32 = vpop.f32.mrf.mxu0 }
  0xf0   : > { %v2027_v33 = vpop.f32.mrf.mxu1  ;;  %v2006_v34 = vadd.f32 %v2005_v32, %v2004_v30 }
  0xf1   : > { %v2028_v35 = vadd.f32 %v2027_v33, %v2026_v31  ;;  %v2007_v36 = vpop.f32.mrf.mxu0 }
  0xf2   : > { %v2029_v37 = vpop.f32.mrf.mxu1 }
  0xf3   : > { %v1430_v38 = vadd.f32 %v2028_v35, %v2006_v34  ;;  %v2008_v39 = vpop.f32.mrf.mxu0 }
  0xf4   : > { %v2030_v40 = vpop.f32.mrf.mxu1 }
 0x10d   : > { %v2048_v41 = vpop.f32.mrf.mxu0 }
 0x10e   : > { %v2070_v42 = vpop.f32.mrf.mxu1 }
 0x10f   : > { %v2049_v43 = vpop.f32.mrf.mxu0 }
 0x110   : > { %v2071_v44 = vpop.f32.mrf.mxu1  ;;  %v2050_v57 = vadd.f32 %v2049_v43, %v2048_v41 }
 0x111   : > { %v2051_v45 = vpop.f32.mrf.mxu0  ;;  %v2072_v59 = vadd.f32 %v2071_v44, %v2070_v42 }
 0x112   : > { %v2073_v46 = vpop.f32.mrf.mxu1  ;;  %v1470_v58 = vadd.f32 %v2050_v57, %v1430_v38 }
 0x113   : > { %v2052_v47 = vpop.f32.mrf.mxu0 }
 0x114   : > { %v2074_v48 = vpop.f32.mrf.mxu1  ;;  %v1510_v61 = vadd.f32 %v2072_v59, %v1470_v58 }
 0x12d   : > { %v2092_v49 = vpop.f32.mrf.mxu0 }
 0x12e   : > { %v2114_v50 = vpop.f32.mrf.mxu1 }
 0x12f   : > { %v2093_v51 = vpop.f32.mrf.mxu0 }
 0x130   : > { %v2115_v52 = vpop.f32.mrf.mxu1  ;;  %v2094_v60 = vadd.f32 %v2093_v51, %v2092_v49 }
 0x131   : > { %v2095_v53 = vpop.f32.mrf.mxu0  ;;  %v2116_v63 = vadd.f32 %v2115_v52, %v2114_v50 }
 0x132   : > { %v2117_v54 = vpop.f32.mrf.mxu1  ;;  %v1550_v62 = vadd.f32 %v2094_v60, %v1510_v61 }
 0x133   : > { %v2096_v55 = vpop.f32.mrf.mxu0 }
 0x134   : > { %v2118_v56 = vpop.f32.mrf.mxu1  ;;  %v1590_v3 = vadd.f32 %v2116_v63, %v1550_v62 }
 0x14d   : > { %v2136_v0 = vpop.f32.mrf.mxu0 }
 0x14e   : > { %v2158_v1 = vpop.f32.mrf.mxu1 }
 0x14f   : > { %v2137_v2 = vpop.f32.mrf.mxu0 }
 0x150   : > { %v2138_v4 = vadd.f32 %v2137_v2, %v2136_v0  ;;  %v2159_v5 = vpop.f32.mrf.mxu1 }
 0x151   : > { %v2139_v6 = vpop.f32.mrf.mxu0  ;;  %v2160_v8 = vadd.f32 %v2159_v5, %v2158_v1 }
 0x152   : > { %v1630_v7 = vadd.f32 %v2138_v4, %v1590_v3  ;;  %v2161_v9 = vpop.f32.mrf.mxu1 }
 0x153   : > { %v2140_v11 = vpop.f32.mrf.mxu0 }
 0x154   : > { %v1670_v13 = vadd.f32 %v2160_v8, %v1630_v7  ;;  %v2162_v14 = vpop.f32.mrf.mxu1 }
 0x155   : > { %v1759_v15 = vpop.f32.mrf.mxu0 }
 0x156   : > { %v1676_v16 = vadd.f32 %v1675_v10, %v1670_v13  ;;  %v1760_v17 = vadd.f32 %v1759_v15, %v1684_v12 }
 0x157   : > { %v2179_v18 = vpop.f32.mrf.mxu0 }
 0x158   : > { %1678 = vst.msk [vmem:[%s265_s24 + $0x1] sm:$0xff] %vm1677_vm3, %v1676_v16 }
 0x159   : > { %1764 = vst.msk [vmem:[%s265_s24] sm:$0x1] %vm1763_vm4, %v1760_v17 }
 0x15a PF: > { %s16_s21 = sadd.s32 1, %s2340_s21  }
 0x15b   : > { %p13_p4 = scmp.ge.s32.totalorder %s16_s21, 4  }
 0x15d   :  { %15 = sbr.rel (!%p13_p4) target bundleno = 1 (0x1), region = 77 }

</bundles_post_ra>
